<compile_context>
chip_gen: v7x
topology: tpu7x:2x2x1
jax: 0.10.0
libtpu: 0.0.40
codegen_flags: <defaults>
</compile_context>

<pallas_src>
import numpy as np
import jax
import jax.numpy as jnp
from jax.experimental import pallas as pl
from jax.experimental.pallas import tpu as pltpu

PI = np.pi

# Below this batch size the fixed pallas_call overhead dominates; use plain XLA.
_PALLAS_MIN_BATCH = 1024


def _round_up(x, m):
    return ((x + m - 1) // m) * m


def pose_predictor_kernel(conf_ref, reg_ref, out_ref):
    conf = conf_ref[...].astype(jnp.float32)   # (TB, N)
    reg = reg_ref[...].astype(jnp.float32)     # (TB, N)
    TB, N = conf.shape

    # Lane indices reused for both the synthesized bin centers and the argmax.
    lane_idx = jax.lax.broadcasted_iota(jnp.int32, (TB, N), 1)

    # bin_centers = arange(N) * 2*pi/N, wrapped into (-pi, pi]
    centers = lane_idx.astype(jnp.float32) * jnp.float32(2.0 * PI / N)
    centers = jnp.where(centers > PI, centers - 2.0 * PI, centers)

    # bin_value = reg + centers, single-period wrap into (-pi, pi]
    bin_value = reg + centers
    bin_value = jnp.where(bin_value > PI, bin_value - 2.0 * PI, bin_value)
    bin_value = jnp.where(bin_value < -PI, bin_value + 2.0 * PI, bin_value)

    # argmax along axis=1 (first occurrence, matching torch.argmax)
    max_conf = jnp.max(conf, axis=1, keepdims=True)
    is_max = conf == max_conf
    candidate_idx = jnp.where(is_max, lane_idx, N)               # non-max -> sentinel N
    argmax_idx = jnp.min(candidate_idx, axis=1, keepdims=True)   # (TB, 1)

    # gather(bin_value, 1, argmax_idx) via one-hot select + row reduce
    onehot = lane_idx == argmax_idx
    out_ref[...] = jnp.sum(jnp.where(onehot, bin_value, 0.0), axis=1, keepdims=True)


def _pick_batch_tile(batch, num_bins, itemsize):
    """Batch-tile size: VMEM accounted with lane padding, multi-step grid."""
    # A (tb, N) tile is lane-padded to 128 in VMEM -> per-row cost uses the
    # padded width, not N*itemsize (10.7x difference at N=12).
    padded_row_bytes = _round_up(num_bins, 128) * itemsize
    # Stay well under the smallest default scoped VMEM (16 MiB on v5e) with
    # 2 inputs x 2 pipeline buffers (+ tiny output): budget 8 MiB total.
    vmem_budget = 8 << 20
    tb_vmem_cap = vmem_budget // (2 * 2 * padded_row_bytes)
    # ~2k f32 rows / ~4k bf16 rows per block already reaches ~85%+ of the HBM
    # streaming roofline; larger tiles only add VMEM pressure (esp. v5e).
    tb_target = 2048 if itemsize >= 4 else 4096
    tb = min(tb_vmem_cap, tb_target)
    # Keep the grid >= 2 steps so ("parallel",) can shard across v7x's 2 TCs
    # and give DMA/compute overlap on single-TC chips.
    half_batch = _round_up(pl.cdiv(batch, 2), 16)
    tb = min(tb, half_batch)
    # Multiple of 16 rows: covers f32 (8,128) and bf16 (16,128) sublane tiling.
    tb = max(16, (tb // 16) * 16)
    return tb


def _pose_predictor_jnp(bin_conf_value, bin_reg_value):
    """Fused XLA path for tiny eval-time batches."""
    _, N = bin_conf_value.shape
    centers = jnp.arange(N, dtype=jnp.float32) * jnp.float32(2.0 * PI / N)
    centers = jnp.where(centers > PI, centers - 2.0 * PI, centers)
    bin_value = bin_reg_value.astype(jnp.float32) + centers[None, :]
    bin_value = jnp.where(bin_value > PI, bin_value - 2.0 * PI, bin_value)
    bin_value = jnp.where(bin_value < -PI, bin_value + 2.0 * PI, bin_value)
    idx = jnp.argmax(bin_conf_value, axis=1)
    return jnp.take_along_axis(bin_value, idx[:, None], axis=1)[:, 0]


def pose_predictor(bin_conf_value, bin_reg_value, *, force_pallas=False):
    """bin_conf_value, bin_reg_value: (B, N), any float dtype. Returns (B,) f32."""
    B, N = bin_conf_value.shape
    if not force_pallas and B < _PALLAS_MIN_BATCH:
        return _pose_predictor_jnp(bin_conf_value, bin_reg_value)

    itemsize = max(jnp.dtype(bin_conf_value.dtype).itemsize,
                   jnp.dtype(bin_reg_value.dtype).itemsize)
    tb = _pick_batch_tile(B, N, itemsize)
    grid = (pl.cdiv(B, tb),)   # partial last block; no jnp.pad, no extra HBM pass

    out = pl.pallas_call(
        pose_predictor_kernel,
        out_shape=jax.ShapeDtypeStruct((B, 1), jnp.float32),
        grid=grid,
        in_specs=[
            pl.BlockSpec((tb, N), lambda i: (i, 0)),
            pl.BlockSpec((tb, N), lambda i: (i, 0)),
        ],
        out_specs=pl.BlockSpec((tb, 1), lambda i: (i, 0)),
        compiler_params=pltpu.CompilerParams(
            dimension_semantics=("parallel",)),
        cost_estimate=pl.CostEstimate(
            flops=6 * B * N,
            transcendentals=0,
            bytes_accessed=2 * B * N * itemsize + B * 4),
    )(bin_conf_value, bin_reg_value)

    # torch .squeeze() on (B, 1) -> (B,). (For B == 1 torch would return 0-d.)
    return out[:, 0]


def pose_predictor_ref(bin_conf_value, bin_reg_value):
    B, N = bin_conf_value.shape
    centers = np.arange(N, dtype=np.float32) * 2.0 * np.pi / N
    centers[centers > np.pi] -= 2.0 * np.pi
    centers = jnp.asarray(centers)
    bin_value = bin_reg_value.astype(jnp.float32) + centers[None, :]
    bin_value = jnp.where(bin_value > PI, bin_value - 2.0 * PI, bin_value)
    bin_value = jnp.where(bin_value < -PI, bin_value + 2.0 * PI, bin_value)
    idx = jnp.argmax(bin_conf_value, axis=1)
    return jnp.take_along_axis(bin_value, idx[:, None], axis=1).reshape(-1)


if __name__ == "__main__":
    key = jax.random.PRNGKey(0)

    # Small shape consistent with the module (eval-time pose bins). Force the
    # Pallas path so the kernel itself is exercised at this size.
    B, NUM_BINS = 8, 12
    k1, k2, k3, k4 = jax.random.split(key, 4)
    bin_conf = jax.random.normal(k1, (B, NUM_BINS), dtype=jnp.float32)
    bin_reg = jax.random.uniform(k2, (B, NUM_BINS), minval=-1.0, maxval=1.0,
                                 dtype=jnp.float32)
    pred = pose_predictor(bin_conf, bin_reg, force_pallas=True)
    jax.block_until_ready(pred)
    ref = pose_predictor_ref(bin_conf, bin_reg)
    np.testing.assert_allclose(np.asarray(pred), np.asarray(ref),
                               rtol=1e-6, atol=1e-6)

    # Auto-dispatch at small B takes the fused jnp path; check it matches too.
    pred_small = pose_predictor(bin_conf, bin_reg)
    np.testing.assert_allclose(np.asarray(pred_small), np.asarray(ref),
                               rtol=1e-6, atol=1e-6)

    # Larger, non-multiple-of-tile bf16 batch: exercises native-dtype streaming,
    # the partial last block (no padding pass), and the multi-step parallel grid.
    B2 = 4100
    bin_conf2 = jax.random.normal(k3, (B2, NUM_BINS), dtype=jnp.bfloat16)
    bin_reg2 = jax.random.uniform(k4, (B2, NUM_BINS), minval=-4.0, maxval=4.0,
                                  dtype=jnp.bfloat16)
    pred2 = pose_predictor(bin_conf2, bin_reg2)
    jax.block_until_ready(pred2)
    ref2 = pose_predictor_ref(bin_conf2, bin_reg2)
    np.testing.assert_allclose(np.asarray(pred2), np.asarray(ref2),
                               rtol=1e-6, atol=1e-6)

    print("KERNEL_OK")
</pallas_src>

<mosaic_0001>
module attributes {stable_mosaic.version = 11 : i64} {
  func.func @pose_predictor_kernel(%arg0: i32, %arg1: memref<16x12xf32, #tpu.memory_space<vmem>>, %arg2: memref<16x12xf32, #tpu.memory_space<vmem>>, %arg3: memref<16x1xf32, #tpu.memory_space<vmem>>) attributes {dimension_semantics = [#tpu.dimension_semantics<parallel>], iteration_bounds = array<i64: 1>, scalar_prefetch = 0 : i64, scratch_operands = 0 : i64, tpu.core_type = #tpu.core_type<tc>, window_params = [{transform_indices = @transform_0, window_bounds = array<i64: 16, 12>}, {transform_indices = @transform_1, window_bounds = array<i64: 16, 12>}, {transform_indices = @transform_2, window_bounds = array<i64: 16, 1>}]} {
    %c0 = arith.constant 0 : index
    %c0_0 = arith.constant 0 : index
    %0 = vector.load %arg1[%c0, %c0_0] : memref<16x12xf32, #tpu.memory_space<vmem>>, vector<16x12xf32>
    %c0_1 = arith.constant 0 : index
    %c0_2 = arith.constant 0 : index
    %1 = vector.load %arg2[%c0_1, %c0_2] : memref<16x12xf32, #tpu.memory_space<vmem>>, vector<16x12xf32>
    %2 = tpu.iota {dimensions = array<i32: 1>} : vector<16x12xi32>
    %3 = arith.sitofp %2 : vector<16x12xi32> to vector<16x12xf32>
    %cst = arith.constant 0.52359879 : f32
    %4 = vector.broadcast %cst : f32 to vector<16x12xf32>
    %5 = arith.mulf %3, %4 : vector<16x12xf32>
    %cst_3 = arith.constant 3.14159274 : f32
    %6 = vector.broadcast %cst_3 : f32 to vector<16x12xf32>
    %7 = arith.cmpf ogt, %5, %6 : vector<16x12xf32>
    %cst_4 = arith.constant 6.28318548 : f32
    %8 = vector.broadcast %cst_4 : f32 to vector<16x12xf32>
    %9 = arith.subf %5, %8 : vector<16x12xf32>
    %10 = arith.select %7, %9, %5 : vector<16x12xi1>, vector<16x12xf32>
    %11 = arith.addf %1, %10 : vector<16x12xf32>
    %cst_5 = arith.constant 3.14159274 : f32
    %12 = vector.broadcast %cst_5 : f32 to vector<16x12xf32>
    %13 = arith.cmpf ogt, %11, %12 : vector<16x12xf32>
    %cst_6 = arith.constant 6.28318548 : f32
    %14 = vector.broadcast %cst_6 : f32 to vector<16x12xf32>
    %15 = arith.subf %11, %14 : vector<16x12xf32>
    %16 = arith.select %13, %15, %11 : vector<16x12xi1>, vector<16x12xf32>
    %cst_7 = arith.constant -3.14159274 : f32
    %17 = vector.broadcast %cst_7 : f32 to vector<16x12xf32>
    %18 = arith.cmpf olt, %16, %17 : vector<16x12xf32>
    %cst_8 = arith.constant 6.28318548 : f32
    %19 = vector.broadcast %cst_8 : f32 to vector<16x12xf32>
    %20 = arith.addf %16, %19 : vector<16x12xf32>
    %21 = arith.select %18, %20, %16 : vector<16x12xi1>, vector<16x12xf32>
    %cst_9 = arith.constant dense<0xFF800000> : vector<16xf32>
    %22 = vector.multi_reduction <maximumf>, %0, %cst_9 [1] : vector<16x12xf32> to vector<16xf32>
    %23 = vector.shape_cast %22 : vector<16xf32> to vector<16x1xf32>
    %24 = vector.broadcast %23 : vector<16x1xf32> to vector<16x12xf32>
    %25 = arith.cmpf oeq, %0, %24 : vector<16x12xf32>
    %c12_i32 = arith.constant 12 : i32
    %26 = vector.broadcast %c12_i32 : i32 to vector<16x12xi32>
    %27 = arith.select %25, %2, %26 : vector<16x12xi1>, vector<16x12xi32>
    %cst_10 = arith.constant dense<2147483647> : vector<16xi32>
    %28 = vector.multi_reduction <minsi>, %27, %cst_10 [1] : vector<16x12xi32> to vector<16xi32>
    %29 = vector.shape_cast %28 : vector<16xi32> to vector<16x1xi32>
    %30 = vector.broadcast %29 : vector<16x1xi32> to vector<16x12xi32>
    %31 = arith.cmpi eq, %2, %30 : vector<16x12xi32>
    %cst_11 = arith.constant 0.000000e+00 : f32
    %32 = vector.broadcast %cst_11 : f32 to vector<16x12xf32>
    %33 = arith.select %31, %21, %32 : vector<16x12xi1>, vector<16x12xf32>
    %cst_12 = arith.constant dense<0.000000e+00> : vector<16xf32>
    %34 = vector.multi_reduction <add>, %33, %cst_12 [1] : vector<16x12xf32> to vector<16xf32>
    %35 = vector.shape_cast %34 : vector<16xf32> to vector<16x1xf32>
    %c0_13 = arith.constant 0 : index
    %c0_14 = arith.constant 0 : index
    %36 = vector.load %arg3[%c0_13, %c0_14] : memref<16x1xf32, #tpu.memory_space<vmem>>, vector<16x1xf32>
    tpu.vector_store %arg3[%c0_13, %c0_14], %35 {strides = array<i32>} : memref<16x1xf32, #tpu.memory_space<vmem>>, vector<16x1xf32>,
    return
  }
  func.func @transform_0(%arg0: i32) -> (i32, i32) {
    %c0_i32 = arith.constant 0 : i32
    %c0_i32_0 = arith.constant 0 : i32
    return %arg0, %c0_i32 : i32, i32
  }
  func.func @transform_1(%arg0: i32) -> (i32, i32) {
    %c0_i32 = arith.constant 0 : i32
    %c0_i32_0 = arith.constant 0 : i32
    return %arg0, %c0_i32 : i32, i32
  }
  func.func @transform_2(%arg0: i32) -> (i32, i32) {
    %c0_i32 = arith.constant 0 : i32
    %c0_i32_0 = arith.constant 0 : i32
    return %arg0, %c0_i32 : i32, i32
  }
}

</mosaic_0001>

<bundles_post_ra>
// kernel: tpu_custom_call.1
= control target key start
LH: loop header
LB: loop body
LE: loop exit
PB: predicated region body
PF: predicated region fallthrough
CT: control target
= control target key end

     0   :  { %7 = vsyncpa [#allocation3], 0  ;;  %s274_s0 = inlined_call_operand.hbm [shape: f32[8,12], index: 0, kind: input, shape index: {}]   ;;  %s275_s1 = inlined_call_operand.hbm [shape: f32[8,12], index: 1, kind: input, shape index: {}]   ;;  %s276_s2 = inlined_call_operand.vmem [shape: f32[8,1], index: 2, kind: output, shape index: {}]  }
   0x1   :  { %8 = vsyncpa [#allocation5], 0 }
   0x2   :  { %13 = vsyncadd [#allocation3], 128  ;;  %s215_s9 = smov [#allocation2]   ;;  %s167_s13 = scalar_lea.hbm %s274_s0, 128 }
   0x3   :  { %s14_s10 = sshll.u32 %s215_s9, 4  ;;  %p168_p0 = scmp.ne.s32.totalorder %s274_s0, %s167_s13  ;;  %s15_s10 = int_to_ptr.vmem [resolvable:$true] %s14_s10 }
   0x4   :  { %p171_p1 = scmp.lt.u32.totalorder %s167_s13, %s274_s0 }
   0x6   :  { %p173_p2 = pnand %p171_p1, %p168_p0 }
   0x8   :  { %176 = shalt.err (!%p173_p2)
}
   0x9   :  { %s177_s18 = scalar_lea.vmem %s15_s10, 128  ;;  %s181_s19 = scalar_lea.vmem %s15_s10, 256 }
   0xa   :  { %p178_p3 = scmp.ne.s32.totalorder %s15_s10, %s177_s18  ;;  %p182_p4 = scmp.lt.s32.totalorder %s15_s10, %s15_s10 }
   0xb   :  { %p183_p5 = scmp.lt.s32.totalorder %s181_s19, %s177_s18 }
   0xd   :  { %p184_p6 = por %p183_p5, %p182_p4 }
   0xf   :  { %p185_p7 = pnand %p184_p6, %p178_p3 }
  0x11   :  { %188 = shalt.err (!%p185_p7)
}
  0x12   :  { %s216_s20 = smov 128   ;;  %s217_s21 = smov 8  }
  0x13   :  { %20 = dma.hbm_to_vmem [thread:$0]  %s274_s0, 128, %s15_s10, [#allocation3], %s216_s20, %s216_s20, %s217_s21  }
  0x14   :  { %25 = vsyncadd [#allocation5], 128  ;;  %s218_s24 = smov [#allocation4]   ;;  %s189_s28 = scalar_lea.hbm %s275_s1, 128 }
  0x15   :  { %s26_s25 = sshll.u32 %s218_s24, 4  ;;  %p190_p8 = scmp.ne.s32.totalorder %s275_s1, %s189_s28  ;;  %s27_s25 = int_to_ptr.vmem [resolvable:$true] %s26_s25 }
  0x16   :  { %p193_p9 = scmp.lt.u32.totalorder %s189_s28, %s275_s1 }
  0x18   :  { %p195_p10 = pnand %p193_p9, %p190_p8 }
  0x1a   :  { %198 = shalt.err (!%p195_p10)
}
  0x1b   :  { %s199_s5 = scalar_lea.vmem %s27_s25, 128  ;;  %s203_s0 = scalar_lea.vmem %s27_s25, 256 }
  0x1c   :  { %p200_p11 = scmp.ne.s32.totalorder %s27_s25, %s199_s5  ;;  %p204_p12 = scmp.lt.s32.totalorder %s27_s25, %s27_s25 }
  0x1d   :  { %p205_p13 = scmp.lt.s32.totalorder %s203_s0, %s199_s5 }
  0x1f   :  { %p206_p0 = por %p205_p13, %p204_p12 }
  0x21   :  { %p207_p1 = pnand %p206_p0, %p200_p11 }
  0x23   :  { %210 = shalt.err (!%p207_p1)
}
  0x24   :  { %32 = dma.hbm_to_vmem [thread:$0]  %s275_s1, 128, %s27_s25, [#allocation5], %s216_s20, %s216_s20, %s217_s21  }
  0x25   :  { %211 = dma.done.wait [#allocation3], 256  }
  0x26   :  { %212 = vsyncadd [#allocation3], 4294967040 }
  0x27   :  { %213 = dma.done.wait [#allocation5], 256  }
  0x28   :  { %214 = vsyncadd [#allocation5], 4294967040  ;;  %vm64_vm0 = vcmask 97280   ;;  %v39_v0 = vld [vmem:[#allocation2] sm:$0xff]  ;;  %v40_v1 = vld [vmem:[#allocation2 + $0x8] sm:$0xff]  ;;  %v43_v4 = vlaneseq  ;;  %vm115_vm12 = vcmask 7168  }
  0x29   :  { %v65_v2 = vsel %vm64_vm0, %v39_v0, -inf  ;;  %v68_v3 = vsel %vm64_vm0, %v40_v1, -inf  ;;  %v41_v27 = vld [vmem:[#allocation4] sm:$0xff]  ;;  %v42_v30 = vld [vmem:[#allocation4 + $0x8] sm:$0xff] }
  0x2a   :  { %66 = vmax.xlane.f32.xlu0 %v65_v2  ;;  %v260_v5 = vand.u32 127, %v43_v4 }
  0x2c   :  { %v45_v24 = vcvt.s32.f32 %v260_v5 }
  0x2e   :  { %69 = vmax.xlane.f32.xlu0 %v68_v3  ;;  %v46_v25 = vmul.f32 0.5235988, %v45_v24 }
  0x30   :  { %v160_v26 = vadd.f32 -6.2831855, %v46_v25  ;;  %vm47_vm5 = vcmp.gt.f32.partialorder %v46_v25, 3.1415927 }
  0x32   :  { %v49_v28 = vsel %vm47_vm5, %v160_v26, %v46_v25 }
  0x33   :  { %v50_v29 = vadd.f32 %v49_v28, %v41_v27  ;;  %v51_v32 = vadd.f32 %v49_v28, %v42_v30 }
  0x35   :  { %v161_v31 = vadd.f32 -6.2831855, %v50_v29  ;;  %vm52_vm6 = vcmp.gt.f32.partialorder %v50_v29, 3.1415927  ;;  %v162_v34 = vadd.f32 -6.2831855, %v51_v32 }
  0x36   :  { %vm53_vm7 = vcmp.gt.f32.partialorder %v51_v32, 3.1415927 }
  0x37   :  { %v56_v33 = vsel %vm52_vm6, %v161_v31, %v50_v29  ;;  %v57_v38 = vsel %vm53_vm7, %v162_v34, %v51_v32 }
  0x38   :  { %v60_v36 = vadd.f32 6.2831855, %v56_v33  ;;  %vm58_vm8 = vcmp.lt.f32.partialorder %v56_v33, -3.1415927  ;;  %v61_v44 = vadd.f32 6.2831855, %v57_v38 }
  0x39   :  { %vm59_vm9 = vcmp.lt.f32.partialorder %v57_v38, -3.1415927 }
  0x3a   :  { %v62_v43 = vsel %vm58_vm8, %v60_v36, %v56_v33  ;;  %v63_v51 = vsel %vm59_vm9, %v61_v44, %v57_v38 }
  0xb7   :  { %v67_v6 = vpop.xlane.xlu0 %66 }
  0xb8   :  { %vm71_vm1 = vcmp.eq.f32.partialorder %v39_v0, %v67_v6 }
  0xb9   :  { %v73_v7 = vsel %vm71_vm1, %v260_v5, 12 }
  0xba   :  { %v75_v8 = vsel %vm64_vm0, %v73_v7, 2147483647 }
  0xbb   :  { %v70_v9 = vpop.xlane.xlu0 %69  ;;  %v77_v10 = vshra.s32 %v75_v8, 16  ;;  %v76_v16 = vand.u32 65535, %v75_v8 }
  0xbc   :  { %vm72_vm2 = vcmp.eq.f32.partialorder %v40_v1, %v70_v9 }
  0xbd   :  { %v74_v11 = vsel %vm72_vm2, %v260_v5, 12  ;;  %v79_v12 = vcvt.s32.f32 %v77_v10  ;;  %v78_v18 = vcvt.s32.f32 %v76_v16 }
  0xbe   :  { %v90_v13 = vsel %vm64_vm0, %v74_v11, 2147483647 }
  0xbf   :  { %80 = vmin.xlane.f32.xlu1 %v79_v12  ;;  %v92_v14 = vshra.s32 %v90_v13, 16  ;;  %v91_v19 = vand.u32 65535, %v90_v13 }
  0xc1   :  { %v94_v15 = vcvt.s32.f32 %v92_v14  ;;  %v93_v22 = vcvt.s32.f32 %v91_v19 }
  0xc3   :  { %95 = vmin.xlane.f32.xlu1 %v94_v15 }
 0x14c   :  { %v81_v17 = vpop.xlane.xlu1 %80 }
 0x14d   :  { %vm82_vm3 = vcmp.eq.f32.partialorder %v79_v12, %v81_v17  ;;  %v87_v35 = vcvt.f32.s32 %v81_v17 }
 0x14e   :  { %v83_v20 = vsel %vm82_vm3, %v78_v18, inf }
 0x14f   :  { %84 = vmin.xlane.f32.xlu0 %v83_v20  ;;  %v88_v39 = vshll.u32 %v87_v35, 16 }
 0x150   :  { %v96_v21 = vpop.xlane.xlu1 %95 }
 0x151   :  { %vm97_vm4 = vcmp.eq.f32.partialorder %v94_v15, %v96_v21  ;;  %v102_v40 = vcvt.f32.s32 %v96_v21 }
 0x152   :  { %v98_v23 = vsel %vm97_vm4, %v93_v22, inf }
 0x153   :  { %99 = vmin.xlane.f32.xlu1 %v98_v23  ;;  %v103_v46 = vshll.u32 %v102_v40, 16 }
 0x1dc   :  { %v85_v37 = vpop.xlane.xlu0 %84 }
 0x1dd   :  { %v86_v41 = vcvt.f32.s32 %v85_v37 }
 0x1df   :  { %v89_v42 = vadd.s32 %v88_v39, %v86_v41 }
 0x1e0   :  { %v100_v45 = vpop.xlane.xlu1 %99 }
 0x1e1   :  { %v101_v47 = vcvt.f32.s32 %v100_v45  ;;  %vm105_vm10 = vcmp.eq.s32.totalorder %v260_v5, %v89_v42 }
 0x1e2   :  { %v107_v48 = vsel %vm105_vm10, %v62_v43, 0.0 }
 0x1e3   :  { %v104_v49 = vadd.s32 %v103_v46, %v101_v47  ;;  %v109_v50 = vsel %vm64_vm0, %v107_v48, 0.0 }
 0x1e4   :  { %110 = vadd.xlane.f32.xlu0 %v109_v50 }
 0x1e5   :  { %vm106_vm11 = vcmp.eq.s32.totalorder %v260_v5, %v104_v49 }
 0x1e6   :  { %v108_v52 = vsel %vm106_vm11, %v63_v51, 0.0 }
 0x1e7   :  { %v112_v53 = vsel %vm64_vm0, %v108_v52, 0.0 }
 0x1e8   :  { %113 = vadd.xlane.f32.xlu1 %v112_v53 }
 0x271   :  { %v111_v54 = vpop.xlane.xlu0 %110 }
 0x272   :  { %116 = vst.msk [vmem:[#allocation6] sm:$0xff] %vm115_vm12, %v111_v54 }
 0x275   :  { %v114_v55 = vpop.xlane.xlu1 %113 }
 0x279   :  { %v147_v56 = vld [vmem:[#allocation6] sm:$0xff] }
 0x27a   :  { %148 = vst [vmem:[%s276_s2] sm:$0xff] %v147_v56 }
 0x27b   :  { %154 = vsyncpa [#allocation3], 1 }
 0x27c   :  { %155 = vsyncpa [#allocation5], 1 }

</bundles_post_ra>
